<compile_context>
chip_gen: v7x
topology: tpu7x:2x2x1
jax: 0.10.0
libtpu: 0.0.40
codegen_flags: <defaults>
</compile_context>

<pallas_src>
import functools

import jax
import jax.numpy as jnp
from jax import lax
from jax.experimental import pallas as pl
from jax.experimental.pallas import tpu as pltpu

LANES = 128            # lane width; all feature dims padded to this
_W1_ROW = 0            # packed-slab row offsets (all 8-sublane aligned)
_W2_ROW = 128
_W3_ROW = 256
_BIAS_ROW = 384        # rows 384/385/386 = b1/b2/b3 ; 387..391 zero padding
_TRI_ROW = 392         # rows 392..519 = upper-triangular ones matrix
_SLAB_ROWS = _TRI_ROW + LANES   # 520 (multiple of 8)

_NEG_BIG = -1e30       # logit bias for padded (phantom) actions


def _round_up(x, m):
    return ((x + m - 1) // m) * m


def _leaky_relu(x, slope=0.01):
    # F.leaky_relu default negative_slope = 0.01
    return jnp.where(x > 0, x, slope * x)


def discrete_policy_kernel(x_ref, u_ref, p_ref, s_ref, act_ref, *,
                           out_dim, matmul_dtype):
    """One batch tile of the DiscretePolicy forward (sample=True path).

    x_ref  : [TB, 128]  lane-padded observations
    u_ref  : [TB, 1]    uniform(0,1) randoms for inverse-CDF categorical sampling
    p_ref  : [520, 128] packed params (W1/W2/W3, biases, tri matrix) -- resident
    s_ref  : [8, 128]   row 0 = batch mean, row 1 = 1/sqrt(var+eps) -- resident
    act_ref: [TB, 128]  lane-dense one-hot action (only first out_dim lanes can fire)
    """
    f32 = jnp.float32
    x = x_ref[...].astype(f32)

    # --- BatchNorm1d(input_dim, affine=False): stats hoisted to the wrapper ---
    mean = s_ref[0:1, :]
    inv_std = s_ref[1:2, :]
    xn = (x - mean) * inv_std

    def dense(h, w_row, b_idx):
        w = p_ref[w_row:w_row + LANES, :]
        b = p_ref[_BIAS_ROW + b_idx:_BIAS_ROW + b_idx + 1, :]
        return jnp.dot(h.astype(matmul_dtype), w.astype(matmul_dtype),
                       preferred_element_type=f32) + b

    # --- fc1 / fc2 (leaky_relu) and fc3 logits ---
    h1 = _leaky_relu(dense(xn, _W1_ROW, 0))
    h2 = _leaky_relu(dense(h1, _W2_ROW, 1))
    logits = dense(h2, _W3_ROW, 2)   # padded lanes get the baked -1e30 bias

    # --- softmax over the action axis ---
    m = jnp.max(logits, axis=1, keepdims=True)
    e = jnp.exp(logits - m)          # padded lanes -> exp(very negative) == 0
    probs = e * pl.reciprocal(jnp.sum(e, axis=1, keepdims=True), approx=True)

    # --- inverse-CDF categorical sample ---
    # inclusive prefix sum along lanes via MXU matmul with precomputed tri matrix
    tri = p_ref[_TRI_ROW:_TRI_ROW + LANES, :]
    csum = jnp.dot(probs, tri, preferred_element_type=f32)        # [TB, 128]

    u = u_ref[...]                                                # [TB, 1]
    idx = jnp.sum((csum <= u).astype(jnp.int32), axis=1, keepdims=True)
    idx = jnp.minimum(idx, out_dim - 1)   # guard fp round-off / approx reciprocal

    cols = lax.broadcasted_iota(jnp.int32, act_ref.shape, 1)
    act_ref[...] = (cols == idx).astype(act_ref.dtype)            # lane-dense store


def discrete_policy_forward(obs, uniforms, packed, out_dim, *,
                            block_b=128, matmul_dtype=jnp.float32):
    """Batch-tiled forward pass.

    obs      : [B, In] f32 observations
    uniforms : [B, 1]  f32 uniforms in [0,1) for sampling
    packed   : [520, 128] packed param slab (see pack_params)
    Returns one-hot actions [B, out_dim] f32.

    matmul_dtype=jnp.bfloat16 enables the bf16-MXU path for v6e/v7x at large batch
    (accumulation stays f32; elementwise/softmax stays f32 for v5e friendliness).
    """
    B, in_dim = obs.shape

    # --- BatchNorm1d training-mode batch stats over the REAL batch (hoisted) ---
    # TODO(synk): eval-mode running statistics not modeled (synthetic init has none).
    mean = jnp.mean(obs, axis=0)
    var = jnp.mean((obs - mean[None, :]) ** 2, axis=0)     # biased var, eps=1e-5
    inv_std = lax.rsqrt(var + 1e-5)
    stats = jnp.zeros((8, LANES), jnp.float32)
    stats = stats.at[0, :in_dim].set(mean)
    stats = stats.at[1, :in_dim].set(inv_std)              # padded lanes -> 0 => xn=0

    # --- batch tiling (pad batch to a tile multiple; pad lanes to 128) ---
    bb = min(_round_up(block_b, 8), _round_up(B, 8))
    B_pad = _round_up(B, bb)
    num_tiles = B_pad // bb

    obs_p = jnp.zeros((B_pad, LANES), jnp.float32).at[:B, :in_dim].set(obs)
    u_p = jnp.zeros((B_pad, 1), jnp.float32).at[:B, :].set(uniforms)

    kernel = functools.partial(discrete_policy_kernel,
                               out_dim=out_dim, matmul_dtype=matmul_dtype)

    act_pad = pl.pallas_call(
        kernel,
        out_shape=jax.ShapeDtypeStruct((B_pad, LANES), jnp.float32),
        grid=(num_tiles,),
        in_specs=[
            pl.BlockSpec((bb, LANES), lambda i: (i, 0)),          # obs tile
            pl.BlockSpec((bb, 1), lambda i: (i, 0)),              # uniforms tile
            pl.BlockSpec((_SLAB_ROWS, LANES), lambda i: (0, 0)),  # params slab (resident)
            pl.BlockSpec((8, LANES), lambda i: (0, 0)),           # BN stats (resident)
        ],
        out_specs=pl.BlockSpec((bb, LANES), lambda i: (i, 0)),    # lane-dense one-hot
        compiler_params=pltpu.CompilerParams(
            dimension_semantics=("parallel",)),                   # megacore-friendly
    )(obs_p, u_p, packed, stats)

    return act_pad[:B, :out_dim]


def init_params(key, input_dim, hidden_dim, out_dim):
    """Deterministic PyTorch-Linear-style init: U(-1/sqrt(fan_in), 1/sqrt(fan_in))."""
    ks = jax.random.split(key, 6)

    def lin(kw, kb, fan_in, fan_out):
        bound = 1.0 / jnp.sqrt(fan_in)
        w = jax.random.uniform(kw, (fan_in, fan_out), jnp.float32, -bound, bound)
        b = jax.random.uniform(kb, (1, fan_out), jnp.float32, -bound, bound)
        return w, b

    w1, b1 = lin(ks[0], ks[1], input_dim, hidden_dim)
    w2, b2 = lin(ks[2], ks[3], hidden_dim, hidden_dim)
    w3, b3 = lin(ks[4], ks[5], hidden_dim, out_dim)
    return {"w1": w1, "b1": b1, "w2": w2, "b2": b2, "w3": w3, "b3": b3}


def pack_params(params, input_dim, hidden_dim, out_dim):
    """Pack all layer params + tri matrix into one lane-padded [520,128] f32 slab."""
    slab = jnp.zeros((_SLAB_ROWS, LANES), jnp.float32)
    slab = slab.at[_W1_ROW:_W1_ROW + input_dim, :hidden_dim].set(params["w1"])
    slab = slab.at[_W2_ROW:_W2_ROW + hidden_dim, :hidden_dim].set(params["w2"])
    slab = slab.at[_W3_ROW:_W3_ROW + hidden_dim, :out_dim].set(params["w3"])
    slab = slab.at[_BIAS_ROW + 0, :hidden_dim].set(params["b1"][0])
    slab = slab.at[_BIAS_ROW + 1, :hidden_dim].set(params["b2"][0])
    # fc3 bias: padded (phantom) action lanes get -1e30 so softmax gives them ~0 mass
    slab = slab.at[_BIAS_ROW + 2, :].set(jnp.full((LANES,), _NEG_BIG, jnp.float32))
    slab = slab.at[_BIAS_ROW + 2, :out_dim].set(params["b3"][0])
    # upper-triangular ones matrix: tri[k, j] = 1 if k <= j  (inclusive prefix sum)
    row = lax.broadcasted_iota(jnp.int32, (LANES, LANES), 0)
    col = lax.broadcasted_iota(jnp.int32, (LANES, LANES), 1)
    slab = slab.at[_TRI_ROW:_TRI_ROW + LANES, :].set((row <= col).astype(jnp.float32))
    return slab


def _ref_probs(obs, params):
    """Pure-JAX reference of BasePolicy forward + softmax (for correctness check)."""
    mean = jnp.mean(obs, axis=0, keepdims=True)
    var = jnp.mean((obs - mean) ** 2, axis=0, keepdims=True)
    xn = (obs - mean) * lax.rsqrt(var + 1e-5)
    h1 = _leaky_relu(xn @ params["w1"] + params["b1"])
    h2 = _leaky_relu(h1 @ params["w2"] + params["b2"])
    out = h2 @ params["w3"] + params["b3"]
    m = jnp.max(out, axis=1, keepdims=True)
    e = jnp.exp(out - m)
    return e / jnp.sum(e, axis=1, keepdims=True)


if __name__ == "__main__":
    B, INPUT_DIM, HIDDEN_DIM, OUT_DIM = 64, 16, 32, 8

    root = jax.random.PRNGKey(0)
    k_obs, k_u, k_par = jax.random.split(root, 3)

    obs = jax.random.normal(k_obs, (B, INPUT_DIM), jnp.float32)
    uniforms = jax.random.uniform(k_u, (B, 1), jnp.float32)
    params = init_params(k_par, INPUT_DIM, HIDDEN_DIM, OUT_DIM)
    packed = pack_params(params, INPUT_DIM, HIDDEN_DIM, OUT_DIM)

    # small block_b here just to exercise the batch grid; use 128+ in production
    act = discrete_policy_forward(obs, uniforms, packed, OUT_DIM, block_b=32)
    act = jax.block_until_ready(act)

    # sanity: result must be one-hot rows over the real action dim
    assert act.shape == (B, OUT_DIM)
    assert bool(jnp.all(jnp.sum(act, axis=1) == 1.0))
    assert bool(jnp.all((act == 0.0) | (act == 1.0)))

    # inverse-CDF consistency vs pure-JAX reference (tolerance covers approx recip)
    probs_ref = _ref_probs(obs, params)
    csum_ref = jnp.cumsum(probs_ref, axis=1)
    kidx = jnp.argmax(act, axis=1)[:, None]
    upper = jnp.take_along_axis(csum_ref, kidx, axis=1)[:, 0]
    lower = upper - jnp.take_along_axis(probs_ref, kidx, axis=1)[:, 0]
    u = uniforms[:, 0]
    tol = 1e-3
    assert bool(jnp.all((u >= lower - tol) & (u <= upper + tol)))

    print("KERNEL_OK")
</pallas_src>

<mosaic_0001>
module attributes {stable_mosaic.version = 11 : i64} {
  func.func @discrete_policy_kernel(%arg0: i32, %arg1: memref<32x128xf32, #tpu.memory_space<vmem>>, %arg2: memref<32x1xf32, #tpu.memory_space<vmem>>, %arg3: memref<520x128xf32, #tpu.memory_space<vmem>>, %arg4: memref<8x128xf32, #tpu.memory_space<vmem>>, %arg5: memref<32x128xf32, #tpu.memory_space<vmem>>) attributes {dimension_semantics = [#tpu.dimension_semantics<parallel>], iteration_bounds = array<i64: 2>, scalar_prefetch = 0 : i64, scratch_operands = 0 : i64, tpu.core_type = #tpu.core_type<tc>, window_params = [{transform_indices = @transform_0, window_bounds = array<i64: 32, 128>}, {transform_indices = @transform_1, window_bounds = array<i64: 32, 1>}, {pipeline_mode = #tpu.pipeline_mode<synchronous>, transform_indices = @transform_2, window_bounds = array<i64: 520, 128>}, {pipeline_mode = #tpu.pipeline_mode<synchronous>, transform_indices = @transform_3, window_bounds = array<i64: 8, 128>}, {transform_indices = @transform_4, window_bounds = array<i64: 32, 128>}]} {
    %c0 = arith.constant 0 : index
    %c0_0 = arith.constant 0 : index
    %0 = vector.load %arg1[%c0, %c0_0] : memref<32x128xf32, #tpu.memory_space<vmem>>, vector<32x128xf32>
    %c0_1 = arith.constant 0 : index
    %c0_2 = arith.constant 0 : index
    %1 = vector.load %arg4[%c0_1, %c0_2] : memref<8x128xf32, #tpu.memory_space<vmem>>, vector<1x128xf32>
    %c1 = arith.constant 1 : index
    %c0_3 = arith.constant 0 : index
    %2 = vector.load %arg4[%c1, %c0_3] : memref<8x128xf32, #tpu.memory_space<vmem>>, vector<1x128xf32>
    %3 = vector.broadcast %1 : vector<1x128xf32> to vector<32x128xf32>
    %4 = arith.subf %0, %3 : vector<32x128xf32>
    %5 = vector.broadcast %2 : vector<1x128xf32> to vector<32x128xf32>
    %6 = arith.mulf %4, %5 : vector<32x128xf32>
    %c0_4 = arith.constant 0 : index
    %c0_5 = arith.constant 0 : index
    %7 = vector.load %arg3[%c0_4, %c0_5] : memref<520x128xf32, #tpu.memory_space<vmem>>, vector<128x128xf32>
    %c384 = arith.constant 384 : index
    %c0_6 = arith.constant 0 : index
    %8 = vector.load %arg3[%c384, %c0_6] : memref<520x128xf32, #tpu.memory_space<vmem>>, vector<1x128xf32>
    %cst = arith.constant dense<0.000000e+00> : vector<32x128xf32>
    %9 = tpu.matmul %6, %7, %cst {dimension_numbers = #tpu.dot_dimension_numbers<[1], [0], [0], [1], [0, 0, 1, 1], [], []>} : vector<32x128xf32>, vector<128x128xf32>, vector<32x128xf32> -> vector<32x128xf32>
    %10 = vector.broadcast %8 : vector<1x128xf32> to vector<32x128xf32>
    %11 = arith.addf %9, %10 : vector<32x128xf32>
    %cst_7 = arith.constant 0.000000e+00 : f32
    %12 = vector.broadcast %cst_7 : f32 to vector<32x128xf32>
    %13 = arith.cmpf ogt, %11, %12 : vector<32x128xf32>
    %cst_8 = arith.constant 0.00999999977 : f32
    %14 = vector.broadcast %cst_8 : f32 to vector<32x128xf32>
    %15 = arith.mulf %14, %11 : vector<32x128xf32>
    %16 = arith.select %13, %11, %15 : vector<32x128xi1>, vector<32x128xf32>
    %c128 = arith.constant 128 : index
    %c0_9 = arith.constant 0 : index
    %17 = vector.load %arg3[%c128, %c0_9] : memref<520x128xf32, #tpu.memory_space<vmem>>, vector<128x128xf32>
    %c385 = arith.constant 385 : index
    %c0_10 = arith.constant 0 : index
    %18 = vector.load %arg3[%c385, %c0_10] : memref<520x128xf32, #tpu.memory_space<vmem>>, vector<1x128xf32>
    %cst_11 = arith.constant dense<0.000000e+00> : vector<32x128xf32>
    %19 = tpu.matmul %16, %17, %cst_11 {dimension_numbers = #tpu.dot_dimension_numbers<[1], [0], [0], [1], [0, 0, 1, 1], [], []>} : vector<32x128xf32>, vector<128x128xf32>, vector<32x128xf32> -> vector<32x128xf32>
    %20 = vector.broadcast %18 : vector<1x128xf32> to vector<32x128xf32>
    %21 = arith.addf %19, %20 : vector<32x128xf32>
    %cst_12 = arith.constant 0.000000e+00 : f32
    %22 = vector.broadcast %cst_12 : f32 to vector<32x128xf32>
    %23 = arith.cmpf ogt, %21, %22 : vector<32x128xf32>
    %cst_13 = arith.constant 0.00999999977 : f32
    %24 = vector.broadcast %cst_13 : f32 to vector<32x128xf32>
    %25 = arith.mulf %24, %21 : vector<32x128xf32>
    %26 = arith.select %23, %21, %25 : vector<32x128xi1>, vector<32x128xf32>
    %c256 = arith.constant 256 : index
    %c0_14 = arith.constant 0 : index
    %27 = vector.load %arg3[%c256, %c0_14] : memref<520x128xf32, #tpu.memory_space<vmem>>, vector<128x128xf32>
    %c386 = arith.constant 386 : index
    %c0_15 = arith.constant 0 : index
    %28 = vector.load %arg3[%c386, %c0_15] : memref<520x128xf32, #tpu.memory_space<vmem>>, vector<1x128xf32>
    %cst_16 = arith.constant dense<0.000000e+00> : vector<32x128xf32>
    %29 = tpu.matmul %26, %27, %cst_16 {dimension_numbers = #tpu.dot_dimension_numbers<[1], [0], [0], [1], [0, 0, 1, 1], [], []>} : vector<32x128xf32>, vector<128x128xf32>, vector<32x128xf32> -> vector<32x128xf32>
    %30 = vector.broadcast %28 : vector<1x128xf32> to vector<32x128xf32>
    %31 = arith.addf %29, %30 : vector<32x128xf32>
    %cst_17 = arith.constant dense<0xFF800000> : vector<32xf32>
    %32 = vector.multi_reduction <maximumf>, %31, %cst_17 [1] : vector<32x128xf32> to vector<32xf32>
    %33 = vector.shape_cast %32 : vector<32xf32> to vector<32x1xf32>
    %34 = vector.broadcast %33 : vector<32x1xf32> to vector<32x128xf32>
    %35 = arith.subf %31, %34 : vector<32x128xf32>
    %36 = math.exp %35 : vector<32x128xf32>
    %cst_18 = arith.constant dense<0.000000e+00> : vector<32xf32>
    %37 = vector.multi_reduction <add>, %36, %cst_18 [1] : vector<32x128xf32> to vector<32xf32>
    %38 = vector.shape_cast %37 : vector<32xf32> to vector<32x1xf32>
    %39 = tpu.reciprocal %38 {approx = true} : vector<32x1xf32> -> vector<32x1xf32>
    %40 = vector.broadcast %39 : vector<32x1xf32> to vector<32x128xf32>
    %41 = arith.mulf %36, %40 : vector<32x128xf32>
    %c392 = arith.constant 392 : index
    %c0_19 = arith.constant 0 : index
    %42 = vector.load %arg3[%c392, %c0_19] : memref<520x128xf32, #tpu.memory_space<vmem>>, vector<128x128xf32>
    %cst_20 = arith.constant dense<0.000000e+00> : vector<32x128xf32>
    %43 = tpu.matmul %41, %42, %cst_20 {dimension_numbers = #tpu.dot_dimension_numbers<[1], [0], [0], [1], [0, 0, 1, 1], [], []>} : vector<32x128xf32>, vector<128x128xf32>, vector<32x128xf32> -> vector<32x128xf32>
    %c0_21 = arith.constant 0 : index
    %c0_22 = arith.constant 0 : index
    %44 = vector.load %arg2[%c0_21, %c0_22] : memref<32x1xf32, #tpu.memory_space<vmem>>, vector<32x1xf32>
    %45 = vector.broadcast %44 : vector<32x1xf32> to vector<32x128xf32>
    %46 = arith.cmpf ole, %43, %45 : vector<32x128xf32>
    %47 = arith.extui %46 : vector<32x128xi1> to vector<32x128xi32>
    %cst_23 = arith.constant dense<0> : vector<32xi32>
    %48 = vector.multi_reduction <add>, %47, %cst_23 [1] : vector<32x128xi32> to vector<32xi32>
    %49 = vector.shape_cast %48 : vector<32xi32> to vector<32x1xi32>
    %c7_i32 = arith.constant 7 : i32
    %50 = vector.broadcast %c7_i32 : i32 to vector<32x1xi32>
    %51 = arith.minsi %49, %50 : vector<32x1xi32>
    %52 = tpu.iota {dimensions = array<i32: 1>} : vector<32x128xi32>
    %53 = vector.broadcast %51 : vector<32x1xi32> to vector<32x128xi32>
    %54 = arith.cmpi eq, %52, %53 : vector<32x128xi32>
    %55 = arith.extui %54 : vector<32x128xi1> to vector<32x128xi32>
    %56 = arith.sitofp %55 : vector<32x128xi32> to vector<32x128xf32>
    %c0_24 = arith.constant 0 : index
    %c0_25 = arith.constant 0 : index
    %57 = vector.load %arg5[%c0_24, %c0_25] : memref<32x128xf32, #tpu.memory_space<vmem>>, vector<32x128xf32>
    tpu.vector_store %arg5[%c0_24, %c0_25], %56 {strides = array<i32>} : memref<32x128xf32, #tpu.memory_space<vmem>>, vector<32x128xf32>,
    return
  }
  func.func @transform_0(%arg0: i32) -> (i32, i32) {
    %c0_i32 = arith.constant 0 : i32
    %c0_i32_0 = arith.constant 0 : i32
    return %arg0, %c0_i32 : i32, i32
  }
  func.func @transform_1(%arg0: i32) -> (i32, i32) {
    %c0_i32 = arith.constant 0 : i32
    %c0_i32_0 = arith.constant 0 : i32
    return %arg0, %c0_i32 : i32, i32
  }
  func.func @transform_2(%arg0: i32) -> (i32, i32) {
    %c0_i32 = arith.constant 0 : i32
    %c0_i32_0 = arith.constant 0 : i32
    %c0_i32_1 = arith.constant 0 : i32
    return %c0_i32, %c0_i32_0 : i32, i32
  }
  func.func @transform_3(%arg0: i32) -> (i32, i32) {
    %c0_i32 = arith.constant 0 : i32
    %c0_i32_0 = arith.constant 0 : i32
    %c0_i32_1 = arith.constant 0 : i32
    return %c0_i32, %c0_i32_0 : i32, i32
  }
  func.func @transform_4(%arg0: i32) -> (i32, i32) {
    %c0_i32 = arith.constant 0 : i32
    %c0_i32_0 = arith.constant 0 : i32
    return %arg0, %c0_i32 : i32, i32
  }
}

</mosaic_0001>

<bundles_post_ra>
// kernel: tpu_custom_call.1
= control target key start
LH: loop header
LB: loop body
LE: loop exit
PB: predicated region body
PF: predicated region fallthrough
CT: control target
= control target key end

     0   :  { %9 = vsyncpa [#allocation3], 0  ;;  %s1714_s0 = inlined_call_operand.vmem [shape: f32[64,128], index: 0, kind: input, shape index: {}]   ;;  %s1715_s1 = inlined_call_operand.vmem [shape: f32[64,1], index: 1, kind: input, shape index: {}]   ;;  %s1716_s2 = inlined_call_operand.hbm [shape: f32[520,128], index: 2, kind: input, shape index: {}]   ;;  %s1717_s3 = inlined_call_operand.vmem [shape: f32[8,128], index: 3, kind: input, shape index: {}]   ;;  %s1718_s4 = inlined_call_operand.hbm [shape: f32[64,128], index: 4, kind: output, shape index: {}]  }
   0x1   :  { %10 = vsyncpa [#allocation4], 0 }
   0x2   :  { %12 = vsyncpa [#allocation4 + $0x1], 0  ;;  %s1532_s15 = smov 0   ;;  %s1534_s16 = smov 0  }
   0x3   :  { %s1536_s17 = smov 0   ;;  %s1538_s18 = smov 0  }
   0x4 LB: > { %s1553_s19 = sadd.s32 4294967295, %s1497_s18   ;;  %s943_s20 = sadd.s32 4294967294, %s1497_s18   ;;  %s1497_s18 = sphi %s1538_s18, %s1734_s18   ;;  %s1493_s17 = sphi %s1536_s17, %s1733_s17   ;;  %s1489_s16 = sphi %s1534_s16, %s1732_s16   ;;  %s1485_s15 = sphi %s1532_s15, %s1731_s15  }
   0x5   : > { %s1557_s21 = sadd.s32 1, %s1497_s18   ;;  %s119_s22 = sadd.s32 1, %s1493_s17 }
   0x6   : > { %s116_s23 = ssub.s32 %s1497_s18, %s1557_s21  ;;  %p129_p0 = scmp.ne.s32.totalorder %s1493_s17, %s1489_s16 }
   0x7   : > { %p117_p1 = scmp.eq.s32.totalorder %s116_s23, 0  ;;  %p130_p2 = scmp.eq.s32.totalorder %s1553_s19, 1 }
   0x8   : > { %p135_p3 = scmp.ne.s32.totalorder %s1489_s16, %s1485_s15  ;;  %p136_p4 = scmp.eq.s32.totalorder %s943_s20, 1 }
   0x9   : > { %s1568_s24 = scalar_select %p117_p1, %s1493_s17, %s119_s22  }
   0xa   : > { %p1570_p5 = por %p130_p2, %p129_p0  ;;  %p1574_p6 = por %p136_p4, %p135_p3 }
   0xb   : > { %p944_p7 = scmp.ge.s32.totalorder %s1497_s18, 1  ;;  %p143_p8 = scmp.lt.s32.totalorder %s1497_s18, 3 }
   0xc   : > { %s1722_s25 = scalar_select %p1570_p5, 1, 0 }
   0xd   : > { %s1723_s26 = scalar_select %p1574_p6, 1, 0 }
   0xe   : > { %p1719_p9 = scmp.eq.s32.totalorder %s1553_s19, 0  ;;  %p1581_p10 = pnand %p944_p7, %p143_p8 }
   0xf   : > { %s1499_s28 = smov [#allocation2]   ;;  %s1403_s7 = scalar_lea.hbm %s1716_s2, 8320 }
  0x10   : > { %s1724_s27 = scalar_select %p1581_p10, 1, 0 }
  0x11   : > { %s155_s29 = sshll.u32 %s1499_s28, 4  ;;  %p1335_p11 = pneg %p1581_p10  ;;  %s156_s29 = int_to_ptr.vmem [resolvable:$true] %s155_s29 }
  0x12   : > { %p1404_p13 = scmp.ne.s32.totalorder %s1716_s2, %s1403_s7  ;;  %p1410_p3 = scmp.lt.u32.totalorder %s1403_s7, %s1716_s2 }
  0x13   : > { %p1589_p12 = pnand %p1719_p9, %p1335_p11 }
  0x15   : > { %p1405_p0 = pneg %p1589_p12 }
  0x17   : > { %p1406_p1 = pnand %p1405_p0, %p1404_p13 }
  0x19   : > { %p1407_p2 = pneg %p1406_p1 }
  0x1b   : > { %p1412_p4 = pnand %p1410_p3, %p1407_p2 }
  0x1d   : > { %1415 = shalt.err (!%p1412_p4)
}
  0x1e   : > { %s1416_s12 = scalar_lea.vmem %s156_s29, 8320  ;;  %p1424_p9 = scmp.lt.s32.totalorder %s156_s29, %s156_s29 }
  0x1f   : > { %p1417_p7 = scmp.ne.s32.totalorder %s156_s29, %s1416_s12  ;;  %p1425_p6 = scmp.lt.s32.totalorder %s1416_s12, %s1416_s12 }
  0x21   : > { %p1419_p8 = pnand %p1417_p7, %p1405_p0  ;;  %p1426_p5 = por %p1425_p6, %p1424_p9 }
  0x23   : > { %p1420_p11 = pneg %p1419_p8 }
  0x25   : > { %p1427_p10 = pnand %p1426_p5, %p1420_p11 }
  0x27   : > { %1430 = shalt.err (!%p1427_p10)
}
  0x28   : > { %s1500_s13 = smov 128   ;;  %s1501_s14 = smov 8  }
  0x29   : > { %1338 = dma.hbm_to_vmem [thread:$0]  (!%p1589_p12), %s1716_s2, 8320, %s156_s29, [#allocation3], %s1500_s13, %s1500_s13, %s1501_s14  }
  0x2a   : > { %p1726_p13 = scmp.ne.s32.totalorder %s1724_s27, 0 }
  0x2b   : > { %p1727_p1 = scmp.eq.s32.totalorder (!%p1726_p13), %s1553_s19, 0 }
  0x2c   : > { %192 = sbr.rel (%p1726_p13) target bundleno = 1460 (0x5b4), region = 36 }
  0x33   : > { %1476 = dma.done.wait (%p1727_p1), [#allocation3], 8320   ;;  %p1728_p0 = pmov %p1727_p1 }
  0x34   : > { %s950_s23 = sshll.u32 %s1553_s19, 2  ;;  %v258_v0 = vld [vmem:[#allocation2] sm:$0xff]  ;;  %v259_v1 = vld [vmem:[#allocation2 + $0x8] sm:$0xff]  ;;  %v260_v2 = vld [vmem:[#allocation2 + $0x10] sm:$0xff]  ;;  %s220_s12 = sand.u32 1, %s1489_s16  }
  0x35   : > { %1478 = vsyncadd (%p1728_p0), [#allocation3], 4294958976  ;;  %p224_p5 = scmp.lt.s32.totalorder %s950_s23, 7  ;;  %v1201_v3 = vpack.c.bf16 %v259_v1, %v258_v0  ;;  %v261_v4 = vld [vmem:[#allocation2 + $0x18] sm:$0xff]  ;;  %v262_v6 = vld [vmem:[#allocation2 + $0x20] sm:$0xff]  ;;  %s949_s13 = sshll.u32 %s220_s12, 5 }
  0x36   : > { %v1205_v5 = vpack.c.bf16 %v261_v4, %v260_v2  ;;  %v263_v7 = vld [vmem:[#allocation2 + $0x28] sm:$0xff]  ;;  %v1630_v10 = vld [vmem:[%s1717_s3] ss:$0 sm:$0xff]  ;;  %v264_v11 = vld [vmem:[#allocation2 + $0x30] sm:$0xff]  ;;  %s1656_s14 = scalar_lea.vmem [#allocation5], %s949_s13  ;;  %s968_s22 = sshll.u32 %s1553_s19, 9 }
  0x37   : > { %s1736_s23 = smov (!%p224_p5, %s950_s23), 7  ;;  %1202 = vmatprep.subr.bf16.mxu0 %v1201_v3  ;;  %v1209_v8 = vpack.c.bf16 %v263_v7, %v262_v6  ;;  %v265_v12 = vld [vmem:[#allocation2 + $0x38] sm:$0xff]  ;;  %v1635_v13 = vld [vmem:[%s1717_s3 + $0x1] ss:$0 sm:$0xff]  ;;  %v377_v16 = vld [vmem:[#allocation2 + $0x88] sm:$0xff]  ;;  %s857_s20 = sshll.u32 %s1656_s14, 4  ;;  %s1662_s20 = int_to_ptr.vmem [resolvable:$true] %s857_s20 }
  0x38   : > { %s951_s28 = sshll.u32 %s1736_s23, 3  ;;  %1204 = vmatpush3.bf16.msra.mxu0 %v1201_v3  ;;  %v376_v15 = vld [vmem:[#allocation2 + $0x80] sm:$0xff]  ;;  %v378_v19 = vld [vmem:[#allocation2 + $0x90] sm:$0xff]  ;;  %v379_v20 = vld [vmem:[#allocation2 + $0x98] sm:$0xff]  ;;  %v1213_v21 = vpack.c.bf16 %v265_v12, %v264_v11  ;;  %s1667_s27 = scalar_lea.hbm %s1718_s4, %s968_s22 }
  0x39   : > { %s1624_s30 = scalar_lea.vmem %s1714_s0, %s951_s28  ;;  %1206 = vmatprep.subr.bf16.mxu0 %v1205_v5  ;;  %v1233_v18 = vpack.c.bf16 %v377_v16, %v376_v15  ;;  %v1237_v22 = vpack.c.bf16 %v379_v20, %v378_v19  ;;  %v380_v23 = vld [vmem:[#allocation2 + $0xa0] sm:$0xff]  ;;  %v381_v24 = vld [vmem:[#allocation2 + $0xa8] sm:$0xff]  ;;  %v382_v29 = vld [vmem:[#allocation2 + $0xb0] sm:$0xff]  ;;  %s233_s11 = scalar_lea.vmem %s1715_s1, %s951_s28 }
  0x3a   : > { %v236_v9 = vld [vmem:[%s1624_s30] sm:$0xff]  ;;  %v267_v26 = vld [vmem:[#allocation2 + $0x48] sm:$0xff]  ;;  %v1241_v27 = vpack.c.bf16 %v381_v24, %v380_v23  ;;  %v383_v30 = vld [vmem:[#allocation2 + $0xb8] sm:$0xff]  ;;  %s1673_s19 = scalar_lea.sflag [#allocation4], %s220_s12  ;;  %s1431_s29 = scalar_lea.vmem %s1662_s20, 512 }
  0x3b   : > { %v246_v14 = vsub.f32 %v236_v9, %v1630_v10  ;;  %v266_v25 = vld [vmem:[#allocation2 + $0x40] sm:$0xff]  ;;  %1234 = vmatprep.subr.bf16.mxu1 %v1233_v18  ;;  %v268_v31 = vld [vmem:[#allocation2 + $0x50] sm:$0xff]  ;;  %v269_v32 = vld [vmem:[#allocation2 + $0x58] sm:$0xff]  ;;  %v1245_v33 = vpack.c.bf16 %v383_v30, %v382_v29  ;;  %p1432_p6 = scmp.ne.s32.totalorder %s1662_s20, %s1431_s29  ;;  %p1729_p9 = scmp.ne.s32.totalorder %s1722_s25, 0 }
  0x3c   : > { %1208 = vmatpush3.bf16.msra.mxu0 %v1205_v5  ;;  %1236 = vmatpush3.bf16.msra.mxu1 %v1233_v18  ;;  %v1217_v28 = vpack.c.bf16 %v267_v26, %v266_v25  ;;  %v1221_v34 = vpack.c.bf16 %v269_v32, %v268_v31  ;;  %v384_v35 = vld [vmem:[#allocation2 + $0xc0] sm:$0xff]  ;;  %v385_v36 = vld [vmem:[#allocation2 + $0xc8] sm:$0xff]  ;;  %v386_v41 = vld [vmem:[#allocation2 + $0xd0] sm:$0xff] }
  0x3d   : > { %v254_v17 = vmul.f32 %v1635_v13, %v246_v14  ;;  %1210 = vmatprep.subr.bf16.mxu0 %v1209_v8  ;;  %1238 = vmatprep.subr.bf16.mxu1 %v1237_v22  ;;  %v270_v37 = vld [vmem:[#allocation2 + $0x60] sm:$0xff]  ;;  %v271_v38 = vld [vmem:[#allocation2 + $0x68] sm:$0xff]  ;;  %v1249_v39 = vpack.c.bf16 %v385_v36, %v384_v35  ;;  %v387_v42 = vld [vmem:[#allocation2 + $0xd8] sm:$0xff]  ;;  %p1433_p10 = pnand %p1432_p6, %p1729_p9 }
  0x3e   : > { %v1225_v40 = vpack.c.bf16 %v271_v38, %v270_v37  ;;  %v272_v43 = vld [vmem:[#allocation2 + $0x70] sm:$0xff]  ;;  %v273_v44 = vld [vmem:[#allocation2 + $0x78] sm:$0xff]  ;;  %v237_v45 = vld [vmem:[%s1624_s30 + $0x8] sm:$0xff]  ;;  %v1253_v46 = vpack.c.bf16 %v387_v42, %v386_v41 }
  0x3f   : > { %1081 = vmatprep.mubr.f32.mxu0 %v254_v17  ;;  %v1229_v47 = vpack.c.bf16 %v273_v44, %v272_v43  ;;  %v238_v48 = vld [vmem:[%s1624_s30 + $0x10] sm:$0xff]  ;;  %v247_v49 = vsub.f32 %v237_v45, %v1630_v10  ;;  %v239_v51 = vld [vmem:[%s1624_s30 + $0x18] sm:$0xff]  ;;  %v388_v56 = vld [vmem:[#allocation2 + $0xe0] sm:$0xff]  ;;  %p1434_p12 = pneg %p1433_p10  ;;  %s1504_s30 = smov [#allocation5]  }
  0x40   : > { %1212 = vmatpush3.bf16.msra.mxu0 %v1209_v8  ;;  %1240 = vmatpush3.bf16.msra.mxu1 %v1237_v22  ;;  %v248_v50 = vsub.f32 %v238_v48, %v1630_v10  ;;  %v249_v53 = vsub.f32 %v239_v51, %v1630_v10  ;;  %v389_v57 = vld [vmem:[#allocation2 + $0xe8] sm:$0xff]  ;;  %v390_v59 = vld [vmem:[#allocation2 + $0xf0] sm:$0xff]  ;;  %v391_v60 = vld [vmem:[#allocation2 + $0xf8] sm:$0xff]  ;;  %s1435_s5 = sshll.u32 %s1504_s30, 4  ;;  %s1436_s5 = int_to_ptr.vmem [resolvable:$false] %s1435_s5 }
  0x41   : > { %1214 = vmatprep.subr.bf16.mxu0 %v1213_v21  ;;  %1242 = vmatprep.subr.bf16.mxu1 %v1241_v27  ;;  %v255_v52 = vmul.f32 %v1635_v13, %v247_v49  ;;  %v1257_v58 = vpack.c.bf16 %v389_v57, %v388_v56  ;;  %v1261_v61 = vpack.c.bf16 %v391_v60, %v390_v59  ;;  %v494_v62 = vld [vmem:[#allocation2 + $0x100] sm:$0xff]  ;;  %v495_v63 = vld [vmem:[#allocation2 + $0x108] sm:$0xff]  ;;  %v496_v0 = vld [vmem:[#allocation2 + $0x110] sm:$0xff]  ;;  %s1437_s6 = scalar_lea.vmem %s1436_s5, 1024  ;;  %p1438_p2 = scmp.lt.s32.totalorder %s1662_s20, %s1436_s5 }
  0x42   : > { %v256_v54 = vmul.f32 %v1635_v13, %v248_v50  ;;  %v257_v55 = vmul.f32 %v1635_v13, %v249_v53  ;;  %v1265_v1 = vpack.c.bf16 %v495_v63, %v494_v62  ;;  %v497_v2 = vld [vmem:[#allocation2 + $0x118] sm:$0xff]  ;;  %v498_v4 = vld [vmem:[#allocation2 + $0x120] sm:$0xff]  ;;  %v499_v5 = vld [vmem:[#allocation2 + $0x128] sm:$0xff]  ;;  %p1439_p3 = scmp.lt.s32.totalorder %s1437_s6, %s1431_s29 }
  0x43   : > { %v1269_v3 = vpack.c.bf16 %v497_v2, %v496_v0  ;;  %v1273_v6 = vpack.c.bf16 %v499_v5, %v498_v4  ;;  %v500_v7 = vld [vmem:[#allocation2 + $0x130] sm:$0xff]  ;;  %v501_v8 = vld [vmem:[#allocation2 + $0x138] sm:$0xff]  ;;  %v502_v10 = vld [vmem:[#allocation2 + $0x140] sm:$0xff] }
  0x44   : > { %1216 = vmatpush3.bf16.msra.mxu0 %v1213_v21  ;;  %1244 = vmatpush3.bf16.msra.mxu1 %v1241_v27  ;;  %v1277_v9 = vpack.c.bf16 %v501_v8, %v500_v7  ;;  %v503_v11 = vld [vmem:[#allocation2 + $0x148] sm:$0xff]  ;;  %v504_v13 = vld [vmem:[#allocation2 + $0x150] sm:$0xff]  ;;  %v505_v14 = vld [vmem:[#allocation2 + $0x158] sm:$0xff]  ;;  %p1440_p4 = por %p1439_p3, %p1438_p2 }
  0x45   : > { %1218 = vmatprep.subr.bf16.mxu0 %v1217_v28  ;;  %1246 = vmatprep.subr.bf16.mxu1 %v1245_v33  ;;  %v1281_v12 = vpack.c.bf16 %v503_v11, %v502_v10  ;;  %v1285_v15 = vpack.c.bf16 %v505_v14, %v504_v13  ;;  %v956_v16 = vld [vmem:[#allocation2 + $0x180] ss:$0 sm:$0xff]  ;;  %v508_v36 = vld [vmem:[#allocation2 + $0x170] sm:$0xff]  ;;  %v509_v37 = vld [vmem:[#allocation2 + $0x178] sm:$0xff] }
  0x46   : > { %v1293_v38 = vpack.c.bf16 %v509_v37, %v508_v36  ;;  %v958_v56 = vld [vmem:[#allocation2 + $0x182] ss:$0 sm:$0xff]  ;;  %v637_v2 = vld [vmem:[#allocation2 + $0x190] sm:$0xff]  ;;  %v640_v7 = vld [vmem:[#allocation2 + $0x1a8] sm:$0xff]  ;;  %p1441_p7 = pnand %p1440_p4, %p1434_p12 }
  0x47   : > { %v639_v5 = vld [vmem:[#allocation2 + $0x1a0] sm:$0xff]  ;;  %v641_v8 = vld [vmem:[#allocation2 + $0x1b0] sm:$0xff]  ;;  %v642_v10 = vld [vmem:[#allocation2 + $0x1b8] sm:$0xff] }
  0x48   : > { %1220 = vmatpush3.bf16.msra.mxu0 %v1217_v28  ;;  %1248 = vmatpush3.bf16.msra.mxu1 %v1245_v33  ;;  %v506_v33 = vld [vmem:[#allocation2 + $0x160] sm:$0xff]  ;;  %v649_v36 = vld [vmem:[#allocation2 + $0x1f0] sm:$0xff] }
  0x49   : > { %1222 = vmatprep.subr.bf16.mxu0 %v1221_v34  ;;  %1250 = vmatprep.subr.bf16.mxu1 %v1249_v39  ;;  %v643_v11 = vld [vmem:[#allocation2 + $0x1c0] sm:$0xff] }
  0x4c   : > { %1224 = vmatpush3.bf16.msra.mxu0 %v1221_v34  ;;  %1252 = vmatpush3.bf16.msra.mxu1 %v1249_v39  ;;  %v507_v34 = vld [vmem:[#allocation2 + $0x168] sm:$0xff]  ;;  %v957_v39 = vld [vmem:[#allocation2 + $0x181] ss:$0 sm:$0xff] }
  0x4d   : > { %1226 = vmatprep.subr.bf16.mxu0 %v1225_v40  ;;  %1254 = vmatprep.subr.bf16.mxu1 %v1253_v46  ;;  %v1289_v35 = vpack.c.bf16 %v507_v34, %v506_v33  ;;  %v647_v33 = vld [vmem:[#allocation2 + $0x1e0] sm:$0xff] }
  0x50   : > { %1228 = vmatpush3.bf16.msra.mxu0 %v1225_v40  ;;  %1256 = vmatpush3.bf16.msra.mxu1 %v1253_v46 }
  0x51   : > { %1230 = vmatprep.subr.bf16.mxu0 %v1229_v47  ;;  %1258 = vmatprep.subr.bf16.mxu1 %v1257_v58 }
  0x54   : > { %1232 = vmatpush3.bf16.msra.mxu0 %v1229_v47  ;;  %1260 = vmatpush3.bf16.msra.mxu1 %v1257_v58 }
  0x55   : > { %1262 = vmatprep.subr.bf16.mxu1 %v1261_v61  ;;  %1266 = vmatprep.subr.bf16.mxu0 %v1265_v1 }
  0x57   : > { %1082 = vmatmul.mubr.f32.vlgmr.msra.gmra.mrb[0].mxu0 %v255_v52 }
  0x58   : > { %1084 = vmatprep.mubr.f32.mxu0 %v256_v54  ;;  %1264 = vmatpush3.bf16.msra.mxu1 %v1261_v61 }
  0x59   : > { %1268 = vmatpush3.bf16.msra.mxu0 %v1265_v1  ;;  %v636_v1 = vld [vmem:[#allocation2 + $0x188] sm:$0xff] }
  0x5a   : > { %1270 = vmatprep.subr.bf16.mxu0 %v1269_v3  ;;  %v1297_v4 = vpack.c.bf16 %v637_v2, %v636_v1 }
  0x5b   : > { %1085 = vmatmul.mubr.f32.gmra.mrb[2].mxu0 %v257_v55 }
  0x5c   : > { %1298 = vmatprep.subr.bf16.mxu1 %v1297_v4 }
  0x5d   : > { %1272 = vmatpush3.bf16.msra.mxu0 %v1269_v3  ;;  %v638_v3 = vld [vmem:[#allocation2 + $0x198] sm:$0xff] }
  0x5e   : > { %1274 = vmatprep.subr.bf16.mxu0 %v1273_v6 }
  0x61   : > { %1276 = vmatpush3.bf16.msra.mxu0 %v1273_v6  ;;  %v1301_v6 = vpack.c.bf16 %v639_v5, %v638_v3 }
  0x62   : > { %1278 = vmatprep.subr.bf16.mxu0 %v1277_v9 }
  0x65   : > { %1280 = vmatpush3.bf16.msra.mxu0 %v1277_v9  ;;  %v1305_v9 = vpack.c.bf16 %v641_v8, %v640_v7 }
  0x66   : > { %1282 = vmatprep.subr.bf16.mxu0 %v1281_v12 }
  0x69   : > { %1284 = vmatpush3.bf16.msra.mxu0 %v1281_v12  ;;  %v1309_v12 = vpack.c.bf16 %v643_v11, %v642_v10 }
  0x6a   : > { %1286 = vmatprep.subr.bf16.mxu0 %v1285_v15 }
  0x6d   : > { %1288 = vmatpush3.bf16.msra.mxu0 %v1285_v15 }
  0x6e   : > { %1290 = vmatprep.subr.bf16.mxu0 %v1289_v35 }
  0x71   : > { %1292 = vmatpush3.bf16.msra.mxu0 %v1289_v35  ;;  %v648_v35 = vld [vmem:[#allocation2 + $0x1e8] sm:$0xff] }
  0x72   : > { %1294 = vmatprep.subr.bf16.mxu0 %v1293_v38  ;;  %v1321_v37 = vpack.c.bf16 %v649_v36, %v648_v35  ;;  %v1503_v36 = vmov 0.0  }
  0x75   : > { %1296 = vmatpush3.bf16.msra.mxu0 %v1293_v38  ;;  %v650_v38 = vld [vmem:[#allocation2 + $0x1f8] sm:$0xff] }
 0x12a   : > { %v1083_v17 = vpop.f32.mrb[0].mxu0 }
 0x12b   : > { %v351_v18 = vadd.f32 %v1083_v17, %v956_v16  ;;  %v345_v19 = vpop.f32.mrb[1].mxu0 }
 0x12c   : > { %v346_v20 = vadd.f32 %v956_v16, %v345_v19 }
 0x12d   : > { %v369_v21 = vmul.f32 0.01, %v351_v18  ;;  %vm365_vm1 = vcmp.gt.f32.partialorder %v351_v18, 0.0 }
 0x12e   : > { %v1086_v22 = vpop.f32.mrb[2].mxu0  ;;  %vm364_vm0 = vcmp.gt.f32.partialorder %v346_v20, 0.0  ;;  %v368_v23 = vmul.f32 0.01, %v346_v20 }
 0x12f   : > { %v361_v24 = vadd.f32 %v1086_v22, %v956_v16  ;;  %v355_v25 = vpop.f32.mrb[3].mxu0  ;;  %v373_v29 = vsel %vm365_vm1, %v351_v18, %v369_v21 }
 0x130   : > { %v356_v26 = vadd.f32 %v956_v16, %v355_v25  ;;  %v372_v27 = vsel %vm364_vm0, %v346_v20, %v368_v23 }
 0x131   : > { %v371_v28 = vmul.f32 0.01, %v361_v24  ;;  %1119 = vmatprep.mubr.f32.mxu1 %v372_v27  ;;  %vm367_vm2 = vcmp.gt.f32.partialorder %v361_v24, 0.0 }
 0x132   : > { %v370_v30 = vmul.f32 0.01, %v356_v26  ;;  %1120 = vmatmul.mubr.f32.vlgmr.msra.gmra.mrb[0].mxu1 %v373_v29  ;;  %vm366_vm3 = vcmp.gt.f32.partialorder %v356_v26, 0.0  ;;  %v644_v29 = vld [vmem:[#allocation2 + $0x1c8] sm:$0xff] }
 0x133   : > { %v375_v31 = vsel %vm367_vm2, %v361_v24, %v371_v28  ;;  %1300 = vmatpush3.bf16.msra.mxu1 %v1297_v4 }
 0x134   : > { %v374_v32 = vsel %vm366_vm3, %v356_v26, %v370_v30  ;;  %1302 = vmatprep.subr.bf16.mxu1 %v1301_v6  ;;  %v645_v30 = vld [vmem:[#allocation2 + $0x1d0] sm:$0xff] }
 0x135   : > { %1122 = vmatprep.mubr.f32.mxu1 %v374_v32  ;;  %v646_v32 = vld [vmem:[#allocation2 + $0x1d8] sm:$0xff] }
 0x136   : > { %1123 = vmatmul.mubr.f32.gmra.mrb[2].mxu1 %v375_v31  ;;  %v1313_v31 = vpack.c.bf16 %v645_v30, %v644_v29  ;;  %v1317_v34 = vpack.c.bf16 %v647_v33, %v646_v32 }
 0x137   : > { %1304 = vmatpush3.bf16.msra.mxu1 %v1301_v6 }
 0x138   : > { %1306 = vmatprep.subr.bf16.mxu1 %v1305_v9 }
 0x13b   : > { %1308 = vmatpush3.bf16.msra.mxu1 %v1305_v9 }
 0x13c   : > { %1310 = vmatprep.subr.bf16.mxu1 %v1309_v12 }
 0x13f   : > { %1312 = vmatpush3.bf16.msra.mxu1 %v1309_v12 }
 0x140   : > { %1314 = vmatprep.subr.bf16.mxu1 %v1313_v31 }
 0x143   : > { %1316 = vmatpush3.bf16.msra.mxu1 %v1313_v31 }
 0x144   : > { %1318 = vmatprep.subr.bf16.mxu1 %v1317_v34 }
 0x147   : > { %1320 = vmatpush3.bf16.msra.mxu1 %v1317_v34 }
 0x148   : > { %1322 = vmatprep.subr.bf16.mxu1 %v1321_v37 }
 0x14b   : > { %1324 = vmatpush3.bf16.msra.mxu1 %v1321_v37 }
 0x205   : > { %v1121_v40 = vpop.f32.mrb[0].mxu1 }
 0x206   : > { %v469_v41 = vadd.f32 %v1121_v40, %v957_v39  ;;  %v463_v42 = vpop.f32.mrb[1].mxu1 }
 0x207   : > { %v464_v43 = vadd.f32 %v957_v39, %v463_v42  ;;  %v738_v42 = vld [vmem:[%s233_s11 + $0x8] sm:$0xff] }
 0x208   : > { %v487_v44 = vmul.f32 0.01, %v469_v41  ;;  %vm483_vm4 = vcmp.gt.f32.partialorder %v469_v41, 0.0 }
 0x209   : > { %v486_v45 = vmul.f32 0.01, %v464_v43  ;;  %v1124_v46 = vpop.f32.mrb[2].mxu1  ;;  %vm482_vm5 = vcmp.gt.f32.partialorder %v464_v43, 0.0 }
 0x20a   : > { %v479_v47 = vadd.f32 %v1124_v46, %v957_v39  ;;  %v473_v48 = vpop.f32.mrb[3].mxu1  ;;  %v491_v51 = vsel %vm483_vm4, %v469_v41, %v487_v44  ;;  %v1502_v41 = vmov 0   ;;  %v739_v44 = vld [vmem:[%s233_s11 + $0x10] sm:$0xff] }
 0x20b   : > { %v474_v49 = vadd.f32 %v957_v39, %v473_v48  ;;  %v490_v50 = vsel %vm482_vm5, %v464_v43, %v486_v45  ;;  %v651_v39 = vld [vmem:[#allocation2 + $0x200] sm:$0xff]  ;;  %1386 = vset.pattern.permute.xlu1 %v1502_v41  ;;  %1385 = vset.pattern.permute.xlu0 %v1502_v41  ;;  %v740_v45 = vld [vmem:[%s233_s11 + $0x18] sm:$0xff] }
 0x20c   : > { %v489_v52 = vmul.f32 0.01, %v479_v47  ;;  %1157 = vmatprep.mubr.f32.mxu0 %v490_v50  ;;  %vm485_vm6 = vcmp.gt.f32.partialorder %v479_v47, 0.0  ;;  %v1325_v40 = vpack.c.bf16 %v651_v39, %v650_v38  ;;  %v737_v43 = vld [vmem:[%s233_s11] sm:$0xff] }
 0x20d   : > { %v488_v53 = vmul.f32 0.01, %v474_v49  ;;  %1158 = vmatmul.mubr.f32.vlgmr.msra.gmra.mrb[4].mxu0 %v491_v51  ;;  %vm484_vm7 = vcmp.gt.f32.partialorder %v474_v49, 0.0 }
 0x20e   : > { %v493_v54 = vsel %vm485_vm6, %v479_v47, %v489_v52  ;;  %1326 = vmatprep.subr.bf16.mxu1 %v1325_v40 }
 0x20f   : > { %v492_v55 = vsel %vm484_vm7, %v474_v49, %v488_v53  ;;  %1328 = vmatpush3.bf16.msra.mxu1 %v1325_v40 }
 0x210   : > { %1160 = vmatprep.mubr.f32.mxu0 %v492_v55 }
 0x211   : > { %1161 = vmatmul.mubr.f32.gmra.mrb[6].mxu0 %v493_v54 }
 0x2e0   : > { %v1159_v57 = vpop.f32.mrb[4].mxu0 }
 0x2e1   : > { %v581_v58 = vpop.f32.mrb[5].mxu0  ;;  %v587_v62 = vadd.f32 %v1159_v57, %v958_v56 }
 0x2e2   : > { %v582_v59 = vadd.f32 %v958_v56, %v581_v58 }
 0x2e4   : > { %v1162_v60 = vpop.f32.mrb[6].mxu0  ;;  %600 = vmax.xlane.f32.xlu0 %v582_v59 }
 0x2e5   : > { %v591_v61 = vpop.f32.mrb[7].mxu0  ;;  %v597_v0 = vadd.f32 %v1162_v60, %v958_v56 }
 0x2e6   : > { %v592_v63 = vadd.f32 %v958_v56, %v591_v61 }
 0x2e8   : > { %604 = vmax.xlane.f32.xlu1 %v592_v63  ;;  %602 = vmax.xlane.f32.xlu0 %v587_v62 }
 0x2ec   : > { %606 = vmax.xlane.f32.xlu1 %v597_v0 }
 0x371   : > { %v601_v13 = vpop.xlane.xlu0 %600 }
 0x372   : > { %v608_v14 = vsub.f32 %v582_v59, %v601_v13 }
 0x374   : > { %v612_v15 = vmul.f32 1.442695, %v608_v14 }
 0x375   : > { %v605_v16 = vpop.xlane.xlu1 %604  ;;  %v603_v17 = vpop.xlane.xlu0 %602 }
 0x376   : > { %1387 = vpow2.f32 %v612_v15  ;;  %v610_v18 = vsub.f32 %v592_v63, %v605_v16  ;;  %v609_v19 = vsub.f32 %v587_v62, %v603_v17 }
 0x378   : > { %v616_v20 = vmul.f32 1.442695, %v610_v18  ;;  %v614_v21 = vmul.f32 1.442695, %v609_v19 }
 0x379   : > { %v607_v22 = vpop.xlane.xlu1 %606 }
 0x37a   : > { %1389 = vpow2.f32 %v616_v20  ;;  %v611_v23 = vsub.f32 %v597_v0, %v607_v22 }
 0x37b   : > { %1391 = vpow2.f32 %v614_v21 }
 0x37c   : > { %v618_v24 = vmul.f32 1.442695, %v611_v23 }
 0x37e   : > { %1393 = vpow2.f32 %v618_v24  ;;  %v825_v24 = vlaneseq }
 0x380   : > { %v1388_v25 = vpop.eup %1387  ;;  %v826_v29 = vand.u32 127, %v825_v24 }
 0x381   : > { %620 = vadd.xlane.f32.xlu0 %v1388_v25 }
 0x384   : > { %v1390_v26 = vpop.eup %1389 }
 0x385   : > { %v1392_v27 = vpop.eup %1391  ;;  %624 = vadd.xlane.f32.xlu0 %v1390_v26 }
 0x386   : > { %622 = vadd.xlane.f32.xlu1 %v1392_v27 }
 0x388   : > { %v1394_v28 = vpop.eup %1393 }
 0x38a   : > { %626 = vadd.xlane.f32.xlu1 %v1394_v28 }
 0x39b   : > { %748 = vperm.xlu1 %1386, %v738_v42   ;;  %743 = vperm.xlu0 %1385, %v737_v43  }
 0x39f   : > { %753 = vperm.xlu1 %1386, %v739_v44  }
 0x3a3   : > { %758 = vperm.xlu1 %1386, %v740_v45  }
 0x40e   : > { %v621_v46 = vpop.xlane.xlu0 %620 }
 0x40f   : > { %1395 = vrcp.f32 %v621_v46 }
 0x412   : > { %v625_v47 = vpop.xlane.xlu0 %624 }
 0x413   : > { %v623_v48 = vpop.xlane.xlu1 %622  ;;  %1397 = vrcp.f32 %v625_v47 }
 0x414   : > { %1399 = vrcp.f32 %v623_v48 }
 0x417   : > { %v627_v49 = vpop.xlane.xlu1 %626 }
 0x418   : > { %1401 = vrcp.f32 %v627_v49 }
 0x419   : > { %v1396_v50 = vpop.eup %1395 }
 0x41a   : > { %v632_v51 = vmul.f32 %v1396_v50, %v1388_v25  ;;  %v744_v59 = vpop.permute.xlu0 %743 }
 0x41b   : > { %v749_v58 = vpop.permute.xlu1 %748 }
 0x41c   : > { %1195 = vmatprep.mubr.f32.mxu1 %v632_v51 }
 0x41d   : > { %v1398_v52 = vpop.eup %1397 }
 0x41e   : > { %v1400_v53 = vpop.eup %1399  ;;  %v634_v54 = vmul.f32 %v1398_v52, %v1390_v26 }
 0x41f   : > { %v633_v55 = vmul.f32 %v1400_v53, %v1392_v27  ;;  %v754_v60 = vpop.permute.xlu1 %753 }
 0x421   : > { %1196 = vmatmul.mubr.f32.vlgmr.msra.gmra.mrb[4].mxu1 %v633_v55 }
 0x422   : > { %v1402_v56 = vpop.eup %1401  ;;  %1198 = vmatprep.mubr.f32.mxu1 %v634_v54 }
 0x423   : > { %v635_v57 = vmul.f32 %v1402_v56, %v1394_v28  ;;  %v759_v8 = vpop.permute.xlu1 %758 }
 0x425   : > { %1199 = vmatmul.mubr.f32.gmra.mrb[6].mxu1 %v635_v57 }
 0x4f4   : > { %v1197_v61 = vpop.f32.mrb[4].mxu1 }
 0x4f5   : > { %vm762_vm8 = vcmp.le.f32.partialorder %v1197_v61, %v749_v58  ;;  %v718_v62 = vpop.f32.mrb[5].mxu1 }
 0x4f6   : > { %v766_v63 = vsel %vm762_vm8, 1, %v1502_v41  ;;  %vm761_vm9 = vcmp.le.f32.partialorder %v718_v62, %v744_v59 }
 0x4f7   : > { %v765_v0 = vsel %vm761_vm9, 1, %v1502_v41  ;;  %v782_v1 = vshrl.u32 %v766_v63, 16  ;;  %v781_v2 = vand.u32 65535, %v766_v63 }
 0x4f8   : > { %v1200_v3 = vpop.f32.mrb[6].mxu1  ;;  %v770_v7 = vshrl.u32 %v765_v0, 16  ;;  %v769_v12 = vand.u32 65535, %v765_v0 }
 0x4f9   : > { %v728_v4 = vpop.f32.mrb[7].mxu1  ;;  %v784_v5 = vcvt.s32.f32 %v782_v1  ;;  %v783_v6 = vcvt.s32.f32 %v781_v2  ;;  %vm764_vm11 = vcmp.le.f32.partialorder %v1200_v3, %v759_v8 }
 0x4fa   : > { %vm763_vm10 = vcmp.le.f32.partialorder %v728_v4, %v754_v60  ;;  %v772_v11 = vcvt.s32.f32 %v770_v7  ;;  %v768_v13 = vsel %vm764_vm11, 1, %v1502_v41  ;;  %v771_v15 = vcvt.s32.f32 %v769_v12 }
 0x4fb   : > { %v767_v9 = vsel %vm763_vm10, 1, %v1502_v41  ;;  %787 = vadd.xlane.f32.xlu0 %v784_v5  ;;  %785 = vadd.xlane.f32.xlu1 %v783_v6  ;;  %v806_v16 = vshrl.u32 %v768_v13, 16  ;;  %v805_v20 = vand.u32 65535, %v768_v13 }
 0x4fc   : > { %v793_v10 = vand.u32 65535, %v767_v9  ;;  %v794_v18 = vshrl.u32 %v767_v9, 16 }
 0x4fd   : > { %v808_v17 = vcvt.s32.f32 %v806_v16  ;;  %v807_v21 = vcvt.s32.f32 %v805_v20 }
 0x4fe   : > { %v795_v14 = vcvt.s32.f32 %v793_v10  ;;  %v796_v19 = vcvt.s32.f32 %v794_v18 }
 0x4ff   : > { %775 = vadd.xlane.f32.xlu1 %v772_v11 }
 0x500   : > { %797 = vadd.xlane.f32.xlu0 %v795_v14 }
 0x503   : > { %773 = vadd.xlane.f32.xlu1 %v771_v15 }
 0x507   : > { %811 = vadd.xlane.f32.xlu1 %v808_v17 }
 0x50b   : > { %799 = vadd.xlane.f32.xlu1 %v796_v19 }
 0x50f   : > { %809 = vadd.xlane.f32.xlu1 %v807_v21 }
 0x588   : > { %v786_v22 = vpop.xlane.xlu1 %785  ;;  %v788_v23 = vpop.xlane.xlu0 %787 }
 0x589   : > { %v790_v25 = vcvt.f32.s32 %v788_v23  ;;  %v789_v26 = vcvt.f32.s32 %v786_v22 }
 0x58b   : > { %v791_v27 = vshll.u32 %v790_v25, 16 }
 0x58c   : > { %v776_v28 = vpop.xlane.xlu1 %775 }
 0x58d   : > { %v792_v30 = vadd.s32 %v791_v27, %v789_v26  ;;  %v778_v31 = vcvt.f32.s32 %v776_v28  ;;  %v798_v41 = vpop.xlane.xlu0 %797 }
 0x58e   : > { %v801_v46 = vcvt.f32.s32 %v798_v41 }
 0x58f   : > { %vm819_vm12 = vcmp.lt.s32.totalorder %v792_v30, 7  ;;  %v779_v34 = vshll.u32 %v778_v31, 16 }
 0x590   : > { %v820_v32 = vsel %vm819_vm12, %v792_v30, 7  ;;  %v774_v33 = vpop.xlane.xlu1 %773 }
 0x591   : > { %vm828_vm13 = vcmp.eq.s32.totalorder %v826_v29, %v820_v32  ;;  %v777_v35 = vcvt.f32.s32 %v774_v33 }
 0x592   : > { %v960_v37 = vsel %vm828_vm13, 1.0, %v1503_v36 }
 0x593   : > { %840 = vst [vmem:[%s1656_s14 + $0x8] sm:$0xff] %v960_v37  ;;  %v780_v38 = vadd.s32 %v779_v34, %v777_v35 }
 0x594   : > { %v812_v39 = vpop.xlane.xlu1 %811 }
 0x595   : > { %vm817_vm14 = vcmp.lt.s32.totalorder %v780_v38, 7  ;;  %v814_v44 = vcvt.f32.s32 %v812_v39 }
 0x596   : > { %v818_v40 = vsel %vm817_vm14, %v780_v38, 7 }
 0x597   : > { %vm827_vm15 = vcmp.eq.s32.totalorder %v826_v29, %v818_v40  ;;  %v815_v49 = vshll.u32 %v814_v44, 16 }
 0x598   : > { %v959_v42 = vsel %vm827_vm15, 1.0, %v1503_v36  ;;  %v800_v43 = vpop.xlane.xlu1 %799 }
 0x599   : > { %839 = vst [vmem:[%s1656_s14] sm:$0xff] %v959_v42  ;;  %v802_v45 = vcvt.f32.s32 %v800_v43 }
 0x59b   : > { %v803_v47 = vshll.u32 %v802_v45, 16 }
 0x59c   : > { %v810_v48 = vpop.xlane.xlu1 %809 }
 0x59d   : > { %v804_v50 = vadd.s32 %v803_v47, %v801_v46  ;;  %v813_v51 = vcvt.f32.s32 %v810_v48 }
 0x59f   : > { %vm821_vm0 = vcmp.lt.s32.totalorder %v804_v50, 7  ;;  %v816_v52 = vadd.s32 %v815_v49, %v813_v51 }
 0x5a0   : > { %v822_v53 = vsel %vm821_vm0, %v804_v50, 7 }
 0x5a1   : > { %vm829_vm1 = vcmp.eq.s32.totalorder %v826_v29, %v822_v53  ;;  %vm823_vm2 = vcmp.lt.s32.totalorder %v816_v52, 7 }
 0x5a2   : > { %v961_v54 = vsel %vm829_vm1, 1.0, %v1503_v36  ;;  %v824_v55 = vsel %vm823_vm2, %v816_v52, 7 }
 0x5a3   : > { %841 = vst [vmem:[%s1656_s14 + $0x10] sm:$0xff] %v961_v54  ;;  %vm830_vm3 = vcmp.eq.s32.totalorder %v826_v29, %v824_v55 }
 0x5a4   : > { %v962_v56 = vsel %vm830_vm3, 1.0, %v1503_v36 }
 0x5a5   : > { %842 = vst [vmem:[%s1656_s14 + $0x18] sm:$0xff] %v962_v56 }
 0x5a6   : > { %1444 = shalt.err (!%p1441_p7)
}
 0x5a7   : > { %s1445_s7 = scalar_lea.hbm %s1667_s27, 512  ;;  %s1449_s10 = scalar_lea.hbm %s1718_s4, 1024 }
 0x5a8   : > { %p1446_p8 = scmp.ne.s32.totalorder %s1667_s27, %s1445_s7  ;;  %p1450_p1 = scmp.lt.u32.totalorder %s1667_s27, %s1718_s4 }
 0x5a9   : > { %p1451_p0 = scmp.lt.u32.totalorder %s1449_s10, %s1445_s7  ;;  %p1453_p6 = scmp.lt.u32.totalorder %s1445_s7, %s1667_s27 }
 0x5aa   : > { %p1447_p11 = pnand %p1446_p8, %p1729_p9 }
 0x5ab   : > { %p1452_p5 = por %p1451_p0, %p1450_p1 }
 0x5ac   : > { %p1448_p13 = pneg %p1447_p11 }
 0x5ad   : > { %p1454_p10 = por %p1453_p6, %p1452_p5 }
 0x5af   : > { %p1455_p12 = pnand %p1454_p10, %p1448_p13 }
 0x5b1   : > { %1458 = shalt.err (!%p1455_p12)
}
 0x5b2   : > { %s1505_s13 = smov 128   ;;  %s1506_s14 = smov 8  }
 0x5b3   : > { %1333 = dma.vmem_to_hbm [thread:$0]  (%p1729_p9), %s1662_s20, 512, %s1667_s27, %s1673_s19, %s1505_s13, %s1505_s13, %s1506_s14  }
 0x5b4 PF: > { %p1345_p2 = scmp.ge.s32.totalorder %s1497_s18, 2  ;;  %s872_s22 = sand.u32 1, %s1485_s15  }
 0x5b5   : > { %p1730_p3 = scmp.ne.s32.totalorder %s1723_s26, 0  ;;  %s873_s23 = scalar_lea.sflag [#allocation4], %s872_s22 }
 0x5b7   : > { %p1340_p4 = pnand %p1345_p2, %p1730_p3 }
 0x5b9   : > { %1480 = dma.done.wait (!%p1340_p4), %s873_s23, 512  }
 0x5ba   : > { %1482 = vsyncadd (!%p1340_p4), %s873_s23, 4294966784  ;;  %p15_p7 = scmp.ge.s32.totalorder %s1557_s21, 4   ;;  %s1731_s15 = smov %s1489_s16 }
 0x5bb   : > { %s1732_s16 = smov %s1493_s17  ;;  %s1733_s17 = smov %s1568_s24 }
 0x5bc   : > { %s1734_s18 = smov %s1557_s21  ;;  %17 = sbr.rel (!%p15_p7) target bundleno = 4 (0x4), region = 79 }
 0x5c3   :  { %878 = vsyncpa [#allocation3], 1 }
 0x5c4   :  { %880 = vsyncpa [#allocation3 + $0x1], 1 }
 0x5c5   :  { %881 = vsyncpa [#allocation4], 1 }
 0x5c6   :  { %883 = vsyncpa [#allocation4 + $0x1], 1 }

</bundles_post_ra>
